<compile_context>
chip_gen: v6e
topology: v6e:2x2x1
jax: 0.10.0
libtpu: 0.0.40
codegen_flags: <defaults>
</compile_context>

<pallas_src>
import jax
import jax.numpy as jnp
from jax.experimental import pallas as pl
from jax.experimental.pallas import tpu as pltpu


def adain_kernel(x_ref, gb_ref, o_ref):
    # x_ref : (TR, HW)  spatial values of TR independent (batch, channel) rows
    # gb_ref: (TR, 2)   packed [gamma, beta] per row (f32)
    # o_ref : (TR, HW)  output tile (input dtype)
    x = x_ref[...].astype(jnp.float32)                         # (TR, HW)
    hw = x.shape[1]
    denom = float(max(hw - 1, 1))                               # ddof=1; guard HW == 1

    # Instance-norm statistics over the spatial (lane) axis — two-pass form.
    mean = jnp.mean(x, axis=1, keepdims=True)                   # (TR, 1)
    diff = x - mean
    var = jnp.sum(diff * diff, axis=1, keepdims=True) / denom   # unbiased (N-1)
    std = jnp.sqrt(var) + 1e-5                                  # eps added to std
    inv_std = pl.reciprocal(std, approx=False)                  # (TR, 1)

    gamma = gb_ref[:, 0:1]                                      # (TR, 1)
    beta = gb_ref[:, 1:2]                                       # (TR, 1)

    # Fold gamma/std and beta - mean*gamma/std so the wide pass is 1 mul + 1 add.
    scale = gamma * inv_std
    shift = beta - mean * scale
    o_ref[...] = (x * scale + shift).astype(o_ref.dtype)


def _sublane_tile(dtype):
    """Native sublane tile for the dtype (packed dtypes tile deeper)."""
    return {4: 8, 2: 16, 1: 32}.get(jnp.dtype(dtype).itemsize, 8)


def _device_kind():
    try:
        return jax.devices()[0].device_kind.lower()
    except Exception:
        return ""


def _target_block_bytes():
    # v7x HBM (~3.2 TB/s) makes the ~0.35us per-grid-step overhead relatively
    # larger, so use bigger tiles there; v5e/v6e are near roofline at ~2 MiB.
    return 4 * 1024 * 1024 if "v7" in _device_kind() else 2 * 1024 * 1024


def _two_tensorcores():
    return "v7" in _device_kind()


def _pick_row_tile(num_rows, bytes_per_row, sublane, target_bytes, min_steps=8):
    """Row tile that is a multiple of `sublane`, keeps the block under
    `target_bytes`, and (for large enough problems) leaves at least
    `min_steps` grid steps so DMA/compute overlap and megacore sharding work."""
    by_bytes = max(sublane, target_bytes // max(bytes_per_row, 1))
    by_steps = max(sublane, num_rows // min_steps)
    tr = min(max(num_rows, sublane), by_bytes, by_steps)
    tr = max(sublane, (tr // sublane) * sublane)
    return tr


def adain_pallas(x, class_embed, w_gamma, b_gamma, w_beta, b_beta):
    """x: (B, C, H, W), class_embed: (B, E). Returns (B, C, H, W) in x.dtype."""
    B, C, H, W = x.shape
    HW = H * W
    R = B * C

    # Keep x in its input dtype (HBM-bandwidth bound kernel); flatten to rows.
    x_rows = x.reshape(R, HW)

    # gamma/beta Linear hoisted out of the kernel: one small XLA matmul.
    emb = class_embed.astype(jnp.float32)
    gamma = emb @ w_gamma.astype(jnp.float32).T + b_gamma.astype(jnp.float32)
    beta = emb @ w_beta.astype(jnp.float32).T + b_beta.astype(jnp.float32)
    gb = jnp.stack([gamma.reshape(R), beta.reshape(R)], axis=-1)  # (R, 2) f32

    itemsize = jnp.dtype(x.dtype).itemsize
    sublane = _sublane_tile(x.dtype)
    # Budget the x block plus the lane-padded (TR, 2) -> (TR, 128) f32 gb block.
    bytes_per_row = HW * itemsize + 128 * 4
    TR = _pick_row_tile(R, bytes_per_row, sublane, _target_block_bytes())

    num_steps = pl.cdiv(R, TR)
    # On v7x keep the number of grid steps even so both TensorCores get work.
    if _two_tensorcores() and num_steps > 1 and num_steps % 2 != 0:
        num_steps += 1
    R_pad = num_steps * TR

    if R_pad != R:
        # Rows are independent instances; padded rows are zeros (std -> eps,
        # gamma/beta -> 0, so no NaNs) and are sliced off after the call.
        x_rows = jnp.pad(x_rows, ((0, R_pad - R), (0, 0)))
        gb = jnp.pad(gb, ((0, R_pad - R), (0, 0)))

    cost = pl.CostEstimate(
        flops=7 * R_pad * HW,
        transcendentals=R_pad,
        bytes_accessed=2 * R_pad * HW * itemsize + 2 * R_pad * 4,
    )

    out_rows = pl.pallas_call(
        adain_kernel,
        out_shape=jax.ShapeDtypeStruct((R_pad, HW), x.dtype),
        grid_spec=pltpu.PrefetchScalarGridSpec(
            num_scalar_prefetch=0,
            grid=(num_steps,),
            in_specs=[
                pl.BlockSpec((TR, HW), lambda i: (i, 0)),
                pl.BlockSpec((TR, 2), lambda i: (i, 0)),
            ],
            out_specs=pl.BlockSpec((TR, HW), lambda i: (i, 0)),
        ),
        compiler_params=pltpu.CompilerParams(
            dimension_semantics=("parallel",),
            vmem_limit_bytes=48 * 1024 * 1024,
        ),
        cost_estimate=cost,
    )(x_rows, gb)

    if R_pad != R:
        out_rows = out_rows[:R]
    return out_rows.reshape(B, C, H, W)


def adain_reference(x, class_embed, w_gamma, b_gamma, w_beta, b_beta):
    """Plain-JAX reference matching the PyTorch forward exactly."""
    B, C, H, W = x.shape
    xr = x.reshape(B, C, -1).astype(jnp.float32)
    mean = xr.mean(axis=2).reshape(B, C, 1, 1)
    std = xr.std(axis=2, ddof=1).reshape(B, C, 1, 1) + 1e-5
    x_norm = (x.astype(jnp.float32) - mean) / std
    gamma = (class_embed @ w_gamma.T + b_gamma).reshape(B, C, 1, 1)
    beta = (class_embed @ w_beta.T + b_beta).reshape(B, C, 1, 1)
    return (gamma * x_norm + beta).astype(x.dtype)


if __name__ == "__main__":
    B, C, H, W = 2, 4, 16, 16
    E = 32

    key = jax.random.PRNGKey(0)
    kx, ke, kwg, kbg, kwb, kbb = jax.random.split(key, 6)

    x = jax.random.normal(kx, (B, C, H, W), dtype=jnp.float32)
    class_embed = jax.random.normal(ke, (B, E), dtype=jnp.float32)

    # PyTorch nn.Linear layout: weight (out, in), bias (out,).
    bound = 1.0 / (E ** 0.5)
    w_gamma = jax.random.uniform(kwg, (C, E), jnp.float32, -bound, bound)
    b_gamma = jax.random.uniform(kbg, (C,), jnp.float32, -bound, bound)
    w_beta = jax.random.uniform(kwb, (C, E), jnp.float32, -bound, bound)
    b_beta = jax.random.uniform(kbb, (C,), jnp.float32, -bound, bound)

    out = adain_pallas(x, class_embed, w_gamma, b_gamma, w_beta, b_beta)
    out = jax.block_until_ready(out)

    ref = adain_reference(x, class_embed, w_gamma, b_gamma, w_beta, b_beta)
    assert out.shape == (B, C, H, W)
    assert jnp.allclose(out, ref, atol=1e-4, rtol=1e-4), "mismatch vs reference"

    print("KERNEL_OK")
</pallas_src>

<mosaic_0001>
module attributes {stable_mosaic.version = 11 : i64} {
  func.func @adain_kernel(%arg0: i32, %arg1: memref<8x256xf32, #tpu.memory_space<vmem>>, %arg2: memref<8x2xf32, #tpu.memory_space<vmem>>, %arg3: memref<8x256xf32, #tpu.memory_space<vmem>>) attributes {dimension_semantics = [#tpu.dimension_semantics<parallel>], iteration_bounds = array<i64: 1>, scalar_prefetch = 0 : i64, scratch_operands = 0 : i64, tpu.core_type = #tpu.core_type<tc>, window_params = [{transform_indices = @transform_0, window_bounds = array<i64: 8, 256>}, {transform_indices = @transform_1, window_bounds = array<i64: 8, 2>}, {transform_indices = @transform_2, window_bounds = array<i64: 8, 256>}]} {
    %c0 = arith.constant 0 : index
    %c0_0 = arith.constant 0 : index
    %0 = vector.load %arg1[%c0, %c0_0] : memref<8x256xf32, #tpu.memory_space<vmem>>, vector<8x256xf32>
    %cst = arith.constant dense<0.000000e+00> : vector<8xf32>
    %1 = vector.multi_reduction <add>, %0, %cst [1] : vector<8x256xf32> to vector<8xf32>
    %2 = vector.shape_cast %1 : vector<8xf32> to vector<8x1xf32>
    %cst_1 = arith.constant 2.560000e+02 : f32
    %3 = vector.broadcast %cst_1 : f32 to vector<8x1xf32>
    %4 = arith.divf %2, %3 : vector<8x1xf32>
    %5 = vector.broadcast %4 : vector<8x1xf32> to vector<8x256xf32>
    %6 = arith.subf %0, %5 : vector<8x256xf32>
    %7 = arith.mulf %6, %6 : vector<8x256xf32>
    %cst_2 = arith.constant dense<0.000000e+00> : vector<8xf32>
    %8 = vector.multi_reduction <add>, %7, %cst_2 [1] : vector<8x256xf32> to vector<8xf32>
    %9 = vector.shape_cast %8 : vector<8xf32> to vector<8x1xf32>
    %cst_3 = arith.constant 2.550000e+02 : f32
    %10 = vector.broadcast %cst_3 : f32 to vector<8x1xf32>
    %11 = arith.divf %9, %10 : vector<8x1xf32>
    %12 = math.sqrt %11 : vector<8x1xf32>
    %cst_4 = arith.constant 9.99999974E-6 : f32
    %13 = vector.broadcast %cst_4 : f32 to vector<8x1xf32>
    %14 = arith.addf %12, %13 : vector<8x1xf32>
    %15 = tpu.reciprocal %14 : vector<8x1xf32> -> vector<8x1xf32>
    %c0_5 = arith.constant 0 : index
    %c0_6 = arith.constant 0 : index
    %16 = vector.load %arg2[%c0_5, %c0_6] : memref<8x2xf32, #tpu.memory_space<vmem>>, vector<8x1xf32>
    %c0_7 = arith.constant 0 : index
    %c1 = arith.constant 1 : index
    %17 = vector.load %arg2[%c0_7, %c1] : memref<8x2xf32, #tpu.memory_space<vmem>>, vector<8x1xf32>
    %18 = arith.mulf %16, %15 : vector<8x1xf32>
    %19 = arith.mulf %4, %18 : vector<8x1xf32>
    %20 = arith.subf %17, %19 : vector<8x1xf32>
    %21 = vector.broadcast %18 : vector<8x1xf32> to vector<8x256xf32>
    %22 = arith.mulf %0, %21 : vector<8x256xf32>
    %23 = vector.broadcast %20 : vector<8x1xf32> to vector<8x256xf32>
    %24 = arith.addf %22, %23 : vector<8x256xf32>
    %c0_8 = arith.constant 0 : index
    %c0_9 = arith.constant 0 : index
    %25 = vector.load %arg3[%c0_8, %c0_9] : memref<8x256xf32, #tpu.memory_space<vmem>>, vector<8x256xf32>
    tpu.vector_store %arg3[%c0_8, %c0_9], %24 {strides = array<i32>} : memref<8x256xf32, #tpu.memory_space<vmem>>, vector<8x256xf32>,
    return
  }
  func.func @transform_0(%arg0: i32) -> (i32, i32) {
    %c0_i32 = arith.constant 0 : i32
    %c0_i32_0 = arith.constant 0 : i32
    return %arg0, %c0_i32 : i32, i32
  }
  func.func @transform_1(%arg0: i32) -> (i32, i32) {
    %c0_i32 = arith.constant 0 : i32
    %c0_i32_0 = arith.constant 0 : i32
    return %arg0, %c0_i32 : i32, i32
  }
  func.func @transform_2(%arg0: i32) -> (i32, i32) {
    %c0_i32 = arith.constant 0 : i32
    %c0_i32_0 = arith.constant 0 : i32
    return %arg0, %c0_i32 : i32, i32
  }
}

</mosaic_0001>

<bundles_post_ra>
// kernel: tpu_custom_call.1
= control target key start
LH: loop header
LB: loop body
LE: loop exit
PB: predicated region body
PF: predicated region fallthrough
CT: control target
= control target key end

     0   :  { %7 = vsyncpa [#allocation3], 0  ;;  %s172_s0 = inlined_call_operand.hbm [shape: f32[8,256], index: 0, kind: input, shape index: {}]   ;;  %s173_s1 = inlined_call_operand.vmem [shape: f32[8,2], index: 1, kind: input, shape index: {}]   ;;  %s174_s2 = inlined_call_operand.hbm [shape: f32[8,256], index: 2, kind: output, shape index: {}]  }
   0x1   :  { %8 = vsyncpa [#allocation4], 0  ;;  %s143_s9 = smov [#allocation2]  }
   0x2   :  { %s15_s10 = sshll.u32 %s143_s9, 4  ;;  %s16_s10 = int_to_ptr.vmem [resolvable:$true] %s15_s10 }
   0x3   :  { %s107_s11 = scalar_lea.vmem %s16_s10, 256  ;;  %p112_p1 = scmp.lt.s32.totalorder %s16_s10, %s16_s10 }
   0x4   :  { %p108_p0 = scmp.ne.s32.totalorder %s16_s10, %s107_s11  ;;  %p113_p2 = scmp.lt.s32.totalorder %s107_s11, %s107_s11 }
   0x6   :  { %p114_p3 = por %p113_p2, %p112_p1 }
   0x8   :  { %p115_p4 = pnand %p114_p3, %p108_p0 }
   0xa   :  { %118 = shalt.err (!%p115_p4)
}
   0xb   :  { %18 = dma.hbm_to_vmem [thread:$0]  %s172_s0, 256, %s16_s10, [#allocation3]  }
   0xc   :  { %139 = dma.done.wait [#allocation3], 256  }
   0xd   :  { %140 = vsyncadd [#allocation3], 4294967040  ;;  %v24_v0 = vld [vmem:[#allocation2] sm:$0xff]  ;;  %v25_v1 = vld [vmem:[#allocation2 + $0x8] sm:$0xff]  ;;  %v144_v10 = vmov 0   ;;  %v145_v19 = vmov 1  }
   0xe   :  { %v26_v2 = vadd.f32 %v25_v1, %v24_v0  ;;  %93 = vset.pattern.permute.xlu1 %v144_v10  ;;  %94 = vset.pattern.permute.xlu0 %v145_v19  ;;  %v49_v20 = vld [vmem:[%s173_s1] sm:$0xff]  ;;  %s146_s15 = smov 1   ;;  %s147_s16 = smov [#allocation5]  }
   0xf   :  { %s79_s17 = sshll.u32 %s147_s16, 4  ;;  %s80_s17 = int_to_ptr.vmem [resolvable:$true] %s79_s17 }
  0x10   :  { %27 = vadd.xlane.f32.xlu0 %v26_v2  ;;  %s119_s1 = scalar_lea.vmem %s80_s17, 256  ;;  %p124_p6 = scmp.lt.s32.totalorder %s80_s17, %s80_s17 }
  0x11   :  { %p120_p5 = scmp.ne.s32.totalorder %s80_s17, %s119_s1  ;;  %p125_p7 = scmp.lt.s32.totalorder %s119_s1, %s119_s1 }
  0x13   :  { %p126_p8 = por %p125_p7, %p124_p6 }
  0x15   :  { %p127_p9 = pnand %p126_p8, %p120_p5 }
  0x99   :  { %v28_v3 = vpop.xlane.xlu0 %27 }
  0x9a   :  { %v30_v4 = vmul.f32 0.00390625, %v28_v3 }
  0x9c   :  { %v31_v5 = vsub.f32 %v24_v0, %v30_v4  ;;  %v32_v6 = vsub.f32 %v25_v1, %v30_v4 }
  0x9e   :  { %v33_v7 = vmul.f32 %v31_v5, %v31_v5  ;;  %v34_v8 = vmul.f32 %v32_v6, %v32_v6 }
  0xa0   :  { %v35_v9 = vadd.f32 %v34_v8, %v33_v7 }
  0xa2   :  { %36 = vadd.xlane.f32.xlu0 %v35_v9 }
 0x12b   :  { %v37_v11 = vpop.xlane.xlu0 %36 }
 0x12c   :  { %v39_v12 = vmul.f32 0.003921569, %v37_v11 }
 0x12e   :  { %95 = vrsqrt.f32 %v39_v12  ;;  %vm42_vm0 = vcmp.eq.f32.partialorder %v39_v12, inf  ;;  %v45_v15 = vand.u32 2147483648, %v39_v12  ;;  %vm44_vm1 = vcmp.eq.f32.partialorder %v39_v12, 0.0 }
 0x13b   :  { %v96_v13 = vpop.eup %95 }
 0x13c   :  { %v41_v14 = vmul.f32 %v96_v13, %v39_v12 }
 0x13e   :  { %v43_v16 = vsel %vm42_vm0, %v39_v12, %v41_v14 }
 0x13f   :  { %v46_v17 = vsel %vm44_vm1, %v45_v15, %v43_v16 }
 0x140   :  { %v47_v18 = vadd.f32 1e-05, %v46_v17 }
 0x142   :  { %97 = vrcp.f32 %v47_v18 }
 0x14f   :  { %v98_v21 = vpop.eup %97 }
 0x150   :  { %v50_v22 = vmul.f32 %v98_v21, %v49_v20 }
 0x152   :  { %v51_v23 = vmul.f32 %v50_v22, %v30_v4 }
 0x154   :  { %53 = vrot.lane.b32.xlu1 %v51_v23, %s146_s15 }
 0x158   :  { %59 = vperm.xlu1 %93, %v50_v22  }
 0x1c6   :  { %v54_v24 = vpop.permute.xlu1 %53 }
 0x1c7   :  { %v56_v25 = vsub.f32 %v49_v20, %v54_v24 }
 0x1c9   :  { %66 = vperm.xlu0 %94, %v56_v25  }
 0x1d3   :  { %v60_v26 = vpop.permute.xlu1 %59 }
 0x1d4   :  { %v62_v27 = vmul.f32 %v60_v26, %v24_v0  ;;  %v63_v28 = vmul.f32 %v60_v26, %v25_v1 }
 0x244   :  { %v67_v29 = vpop.permute.xlu0 %66 }
 0x245   :  { %v69_v30 = vadd.f32 %v67_v29, %v62_v27  ;;  %v70_v31 = vadd.f32 %v67_v29, %v63_v28 }
 0x247   :  { %71 = vst [vmem:[#allocation5] sm:$0xff] %v69_v30  ;;  %72 = vst [vmem:[#allocation5 + $0x8] sm:$0xff] %v70_v31 }
 0x248   :  { %130 = shalt.err (!%p127_p9)
}
 0x249   :  { %82 = dma.vmem_to_hbm [thread:$0]  %s80_s17, 256, %s174_s2, [#allocation4]  }
 0x24a   :  { %141 = dma.done.wait [#allocation4], 256  }
 0x24b   :  { %142 = vsyncadd [#allocation4], 4294967040 }
 0x24c   :  { %86 = vsyncpa [#allocation3], 1 }
 0x24d   :  { %87 = vsyncpa [#allocation4], 1 }

</bundles_post_ra>
